<compile_context>
chip_gen: v7x
topology: tpu7x:2x2x1
jax: 0.10.0
libtpu: 0.0.40
codegen_flags: <defaults>
</compile_context>

<pallas_src>
import jax
import jax.numpy as jnp
from jax.experimental import pallas as pl
from jax.experimental.pallas import tpu as pltpu


def generator_kernel(x_ref, w1_ref, b1_ref, w2_ref, b2_ref, o_ref):
    """One N-tile of the fused 2-layer MLP with ReLU after each layer.

    x_ref : (B, IN)     bf16  (VMEM-resident, same block every step)
    w1_ref: (IN, 512)   bf16  (VMEM-resident)
    b1_ref: (1, 512)    f32   (VMEM-resident)
    w2_ref: (512, TN)   bf16  (streamed, contiguous pre-tiled slab)
    b2_ref: (1, TN)     f32   (streamed)
    o_ref : (B, TN)     f32
    """
    # fc1 + ReLU, recomputed per tile (cheap; inputs never leave VMEM).
    h = jnp.dot(x_ref[...], w1_ref[...], preferred_element_type=jnp.float32)
    h = jnp.maximum(h + b1_ref[...], 0.0)

    # fc2 tile + ReLU on the MXU with f32 accumulation.
    y = jnp.dot(h.astype(w2_ref.dtype), w2_ref[...],
                preferred_element_type=jnp.float32)
    o_ref[...] = jnp.maximum(y + b2_ref[...], 0.0).astype(o_ref.dtype)


def _pick_tile_n(out_dim, cap=8192):
    """Largest N tile <= cap that exactly divides out_dim.

    Preference order: 256-aligned divisor, 128-aligned divisor, then the
    largest plain divisor <= cap (keeps the grid exact; lanes may be masked).
    """
    if out_dim <= cap:
        return out_dim
    for align in (256, 128):
        start = cap - (cap % align)
        for tn in range(start, 0, -align):
            if out_dim % tn == 0:
                return tn
    for tn in range(cap, 0, -1):
        if out_dim % tn == 0:
            return tn
    return out_dim  # unreachable (tn=1 always divides)


def prepare_w2_tiles(w2, tile_n):
    """One-time parameter prep: (hidden, out_dim) -> contiguous (num_tiles, hidden, tile_n).

    Tile j equals w2[:, j*tile_n:(j+1)*tile_n]; laid out contiguously so each
    grid step's weight DMA is a single contiguous slab.
    """
    hidden, out_dim = w2.shape
    assert out_dim % tile_n == 0
    num_tiles = out_dim // tile_n
    return w2.reshape(hidden, num_tiles, tile_n).transpose(1, 0, 2)


def generator_forward(x, w1, b1, w2, b2, *, output_channels, resolution,
                      tile_n=None, core_parallel=False):
    """Fused, N-tiled Pallas forward; returns NCHW (batch, C, R, R) f32.

    `w2` may be passed either as the flat (hidden, out_dim) matrix or, better,
    pre-tiled via `prepare_w2_tiles` as (num_tiles, hidden, tile_n).
    Set core_parallel=True on v7x (2 TCs/chip, keep num_tiles even).
    """
    batch, in_dim = x.shape
    hidden = w1.shape[1]
    out_dim = resolution * resolution * output_channels
    assert b1.shape == (1, hidden)
    assert b2.shape == (1, out_dim)

    if w2.ndim == 3:
        num_tiles, w2_hidden, tn = w2.shape
        assert w2_hidden == hidden and num_tiles * tn == out_dim
        w2_tiled = w2
    else:
        assert w2.shape == (hidden, out_dim)
        tn = tile_n if tile_n is not None else _pick_tile_n(out_dim)
        assert out_dim % tn == 0
        num_tiles = out_dim // tn
        # Prefer hoisting this to parameter-prep time (prepare_w2_tiles).
        w2_tiled = prepare_w2_tiles(w2, tn)

    # Stream weights in their (bf16) storage dtype; activations match.
    x_c = x.astype(w1.dtype)

    # Pipeline depth on the streamed w2 slabs: a third buffer only when tiles
    # are small (<= 4 MiB) and the grid is long enough to benefit; at TN=8192
    # the default double buffering (2 x 8 MiB) is the right choice everywhere.
    w2_tile_bytes = hidden * tn * jnp.dtype(w2_tiled.dtype).itemsize
    if num_tiles >= 3 and 3 * w2_tile_bytes <= 12 * 1024 * 1024:
        w2_spec = pl.BlockSpec((None, hidden, tn), lambda j: (j, 0, 0),
                               pipeline_mode=pl.Buffered(3))
    else:
        w2_spec = pl.BlockSpec((None, hidden, tn), lambda j: (j, 0, 0))

    itemsize = lambda a: jnp.dtype(a.dtype).itemsize
    cost = pl.CostEstimate(
        flops=2 * batch * (in_dim * hidden + hidden * out_dim),
        transcendentals=0,
        bytes_accessed=(x_c.size * itemsize(x_c)
                        + w1.size * itemsize(w1) + b1.size * itemsize(b1)
                        + w2_tiled.size * itemsize(w2_tiled)
                        + b2.size * itemsize(b2)
                        + batch * out_dim * 4),
    )

    # v7x: CORE_PARALLEL guarantees the N axis is split across both
    # TensorCores; plain "parallel" is a portable no-op on single-TC chips.
    dim_sem = (pltpu.CORE_PARALLEL,) if core_parallel else ("parallel",)

    flat = pl.pallas_call(
        generator_kernel,
        out_shape=jax.ShapeDtypeStruct((batch, out_dim), jnp.float32),
        grid_spec=pltpu.PrefetchScalarGridSpec(
            num_scalar_prefetch=0,
            grid=(num_tiles,),
            in_specs=[
                # Small, VMEM-resident operands (block index never changes).
                pl.BlockSpec((batch, in_dim), lambda j: (0, 0)),
                pl.BlockSpec((in_dim, hidden), lambda j: (0, 0)),
                pl.BlockSpec((1, hidden), lambda j: (0, 0)),
                # Streamed fc2 weight (contiguous pre-tiled slab) and bias.
                w2_spec,
                pl.BlockSpec((1, tn), lambda j: (0, j)),
            ],
            out_specs=pl.BlockSpec((batch, tn), lambda j: (0, j)),
        ),
        compiler_params=pltpu.CompilerParams(
            dimension_semantics=dim_sem,
            vmem_limit_bytes=32 * 1024 * 1024,
        ),
        cost_estimate=cost,
    )(x_c, w1, b1, w2_tiled, b2)

    # Equivalent of torch `.view(-1, output_channels, resolution, resolution)`
    return flat.reshape(batch, output_channels, resolution, resolution)


def init_params(key, input_size, hidden, out_dim, param_dtype=jnp.bfloat16):
    """Deterministic synthetic parameters (PyTorch Linear shapes, transposed).

    Weights stored in bf16 (the kernel is weight-bandwidth bound); biases stay
    f32 since bias-add / ReLU run in f32.
    """
    k1, k2, k3, k4 = jax.random.split(key, 4)
    # fc1.weight is (512, input_size) in torch; we store (input_size, 512).
    w1 = (jax.random.normal(k1, (input_size, hidden), jnp.float32) * 0.05).astype(param_dtype)
    b1 = jax.random.normal(k2, (1, hidden), jnp.float32) * 0.05
    # fc2.weight is (out_dim, 512) in torch; we store (512, out_dim).
    w2 = (jax.random.normal(k3, (hidden, out_dim), jnp.float32) * 0.05).astype(param_dtype)
    b2 = jax.random.normal(k4, (1, out_dim), jnp.float32) * 0.05
    return w1, b1, w2, b2


if __name__ == "__main__":
    def run_case(kx, kp, *, batch, input_size, output_channels, resolution,
                 tile_n=None):
        hidden = 512
        out_dim = resolution * resolution * output_channels
        x = jax.random.normal(kx, (batch, input_size), jnp.float32)
        w1, b1, w2, b2 = init_params(kp, input_size, hidden, out_dim)

        # One-time parameter prep: contiguous per-tile w2 layout.
        tn = tile_n if tile_n is not None else _pick_tile_n(out_dim)
        w2_tiled = prepare_w2_tiles(w2, tn)

        out = generator_forward(
            x, w1, b1, w2_tiled, b2,
            output_channels=output_channels, resolution=resolution,
        )
        out = jax.block_until_ready(out)

        # Pure-JAX reference with the same bf16 params / mixed-precision recipe.
        xb = x.astype(w1.dtype)
        h_ref = jnp.maximum(
            jnp.dot(xb, w1, preferred_element_type=jnp.float32) + b1, 0.0)
        y_ref = jnp.maximum(
            jnp.dot(h_ref.astype(w2.dtype), w2,
                    preferred_element_type=jnp.float32) + b2, 0.0)
        ref = y_ref.reshape(batch, output_channels, resolution, resolution)

        assert out.shape == (batch, output_channels, resolution, resolution)
        assert out.dtype == jnp.float32
        assert jnp.allclose(out, ref, atol=1e-2, rtol=1e-2), \
            float(jnp.max(jnp.abs(out - ref)))

    key = jax.random.PRNGKey(0)
    k1, k2, k3, k4 = jax.random.split(key, 4)

    # Small single-tile case (grid = 1), stand-in for resolution=128.
    run_case(k1, k2, batch=2, input_size=64, output_channels=1, resolution=16)

    # Multi-tile case: exercises the contiguous pre-tiled w2 stream over a
    # 4-step grid and the Buffered(3) pipeline-depth path.
    run_case(k3, k4, batch=2, input_size=64, output_channels=1, resolution=32,
             tile_n=256)

    print("KERNEL_OK")
</pallas_src>

<mosaic_0001>
module attributes {stable_mosaic.version = 11 : i64} {
  func.func @generator_kernel(%arg0: i32, %arg1: memref<2x64xbf16, #tpu.memory_space<vmem>>, %arg2: memref<64x512xbf16, #tpu.memory_space<vmem>>, %arg3: memref<1x512xf32, #tpu.memory_space<vmem>>, %arg4: memref<1x512x256xbf16, #tpu.memory_space<vmem>>, %arg5: memref<1x256xf32, #tpu.memory_space<vmem>>, %arg6: memref<2x256xf32, #tpu.memory_space<vmem>>) attributes {dimension_semantics = [#tpu.dimension_semantics<parallel>], iteration_bounds = array<i64: 1>, scalar_prefetch = 0 : i64, scratch_operands = 0 : i64, tpu.core_type = #tpu.core_type<tc>, window_params = [{pipeline_mode = #tpu.pipeline_mode<synchronous>, transform_indices = @transform_0, window_bounds = array<i64: 2, 64>}, {pipeline_mode = #tpu.pipeline_mode<synchronous>, transform_indices = @transform_1, window_bounds = array<i64: 64, 512>}, {pipeline_mode = #tpu.pipeline_mode<synchronous>, transform_indices = @transform_2, window_bounds = array<i64: 1, 512>}, {transform_indices = @transform_3, window_bounds = array<i64: 1, 512, 256>}, {transform_indices = @transform_4, window_bounds = array<i64: 1, 256>}, {transform_indices = @transform_5, window_bounds = array<i64: 2, 256>}]} {
    %c0 = arith.constant 0 : index
    %c0_0 = arith.constant 0 : index
    %0 = vector.load %arg1[%c0, %c0_0] : memref<2x64xbf16, #tpu.memory_space<vmem>>, vector<2x64xbf16>
    %c0_1 = arith.constant 0 : index
    %c0_2 = arith.constant 0 : index
    %1 = vector.load %arg2[%c0_1, %c0_2] : memref<64x512xbf16, #tpu.memory_space<vmem>>, vector<64x512xbf16>
    %cst = arith.constant dense<0.000000e+00> : vector<2x512xf32>
    %2 = tpu.matmul %0, %1, %cst {dimension_numbers = #tpu.dot_dimension_numbers<[1], [0], [0], [1], [0, 0, 1, 1], [], []>} : vector<2x64xbf16>, vector<64x512xbf16>, vector<2x512xf32> -> vector<2x512xf32>
    %c0_3 = arith.constant 0 : index
    %c0_4 = arith.constant 0 : index
    %3 = vector.load %arg3[%c0_3, %c0_4] : memref<1x512xf32, #tpu.memory_space<vmem>>, vector<1x512xf32>
    %4 = vector.broadcast %3 : vector<1x512xf32> to vector<2x512xf32>
    %5 = arith.addf %2, %4 : vector<2x512xf32>
    %cst_5 = arith.constant 0.000000e+00 : f32
    %6 = vector.broadcast %cst_5 : f32 to vector<2x512xf32>
    %7 = arith.maximumf %5, %6 : vector<2x512xf32>
    %8 = arith.truncf %7 : vector<2x512xf32> to vector<2x512xbf16>
    %c0_6 = arith.constant 0 : index
    %c0_7 = arith.constant 0 : index
    %c0_8 = arith.constant 0 : index
    %9 = vector.load %arg4[%c0_6, %c0_7, %c0_8] : memref<1x512x256xbf16, #tpu.memory_space<vmem>>, vector<1x512x256xbf16>
    %10 = vector.shape_cast %9 : vector<1x512x256xbf16> to vector<512x256xbf16>
    %cst_9 = arith.constant dense<0.000000e+00> : vector<2x256xf32>
    %11 = tpu.matmul %8, %10, %cst_9 {dimension_numbers = #tpu.dot_dimension_numbers<[1], [0], [0], [1], [0, 0, 1, 1], [], []>} : vector<2x512xbf16>, vector<512x256xbf16>, vector<2x256xf32> -> vector<2x256xf32>
    %c0_10 = arith.constant 0 : index
    %c0_11 = arith.constant 0 : index
    %12 = vector.load %arg5[%c0_10, %c0_11] : memref<1x256xf32, #tpu.memory_space<vmem>>, vector<1x256xf32>
    %13 = vector.broadcast %12 : vector<1x256xf32> to vector<2x256xf32>
    %14 = arith.addf %11, %13 : vector<2x256xf32>
    %cst_12 = arith.constant 0.000000e+00 : f32
    %15 = vector.broadcast %cst_12 : f32 to vector<2x256xf32>
    %16 = arith.maximumf %14, %15 : vector<2x256xf32>
    %c0_13 = arith.constant 0 : index
    %c0_14 = arith.constant 0 : index
    %17 = vector.load %arg6[%c0_13, %c0_14] : memref<2x256xf32, #tpu.memory_space<vmem>>, vector<2x256xf32>
    tpu.vector_store %arg6[%c0_13, %c0_14], %16 {strides = array<i32>} : memref<2x256xf32, #tpu.memory_space<vmem>>, vector<2x256xf32>,
    return
  }
  func.func @transform_0(%arg0: i32) -> (i32, i32) {
    %c0_i32 = arith.constant 0 : i32
    %c0_i32_0 = arith.constant 0 : i32
    %c0_i32_1 = arith.constant 0 : i32
    return %c0_i32, %c0_i32_0 : i32, i32
  }
  func.func @transform_1(%arg0: i32) -> (i32, i32) {
    %c0_i32 = arith.constant 0 : i32
    %c0_i32_0 = arith.constant 0 : i32
    %c0_i32_1 = arith.constant 0 : i32
    return %c0_i32, %c0_i32_0 : i32, i32
  }
  func.func @transform_2(%arg0: i32) -> (i32, i32) {
    %c0_i32 = arith.constant 0 : i32
    %c0_i32_0 = arith.constant 0 : i32
    %c0_i32_1 = arith.constant 0 : i32
    return %c0_i32, %c0_i32_0 : i32, i32
  }
  func.func @transform_3(%arg0: i32) -> (i32, i32, i32) {
    %c0_i32 = arith.constant 0 : i32
    %c0_i32_0 = arith.constant 0 : i32
    %c0_i32_1 = arith.constant 0 : i32
    return %arg0, %c0_i32, %c0_i32_0 : i32, i32, i32
  }
  func.func @transform_4(%arg0: i32) -> (i32, i32) {
    %c0_i32 = arith.constant 0 : i32
    %c0_i32_0 = arith.constant 0 : i32
    return %c0_i32, %arg0 : i32, i32
  }
  func.func @transform_5(%arg0: i32) -> (i32, i32) {
    %c0_i32 = arith.constant 0 : i32
    %c0_i32_0 = arith.constant 0 : i32
    return %c0_i32, %arg0 : i32, i32
  }
}

</mosaic_0001>

<bundles_post_ra>
// kernel: tpu_custom_call.1
= control target key start
LH: loop header
LB: loop body
LE: loop exit
PB: predicated region body
PF: predicated region fallthrough
CT: control target
= control target key end

     0   :  { %10 = vsyncpa [#allocation3], 0  ;;  %s1185_s0 = inlined_call_operand.hbm [shape: bf16[2,64], index: 0, kind: input, shape index: {}]   ;;  %s1186_s1 = inlined_call_operand.hbm [shape: bf16[64,512], index: 1, kind: input, shape index: {}]   ;;  %s1187_s2 = inlined_call_operand.vmem [shape: f32[1,512], index: 2, kind: input, shape index: {}]   ;;  %s1188_s3 = inlined_call_operand.hbm [shape: bf16[1,512,256], index: 3, kind: input, shape index: {}]   ;;  %s1189_s4 = inlined_call_operand.vmem [shape: f32[1,256], index: 4, kind: input, shape index: {}]   ;;  %s1190_s5 = inlined_call_operand.hbm [shape: f32[2,256], index: 5, kind: output, shape index: {}]  }
   0x1   :  { %11 = vsyncpa [#allocation6], 0 }
   0x2   :  { %12 = vsyncpa [#allocation4], 0  ;;  %s1092_s18 = smov [#allocation5]   ;;  %s998_s22 = scalar_lea.hbm %s1186_s1, 2048 }
   0x3   :  { %s28_s19 = sshll.u32 %s1092_s18, 4  ;;  %p999_p0 = scmp.ne.s32.totalorder %s1186_s1, %s998_s22  ;;  %s29_s19 = int_to_ptr.vmem [resolvable:$true] %s28_s19 }
   0x4   :  { %p1002_p1 = scmp.lt.u32.totalorder %s998_s22, %s1186_s1 }
   0x6   :  { %p1004_p2 = pnand %p1002_p1, %p999_p0 }
   0x8   :  { %1007 = shalt.err (!%p1004_p2)
}
   0x9   :  { %s1008_s27 = scalar_lea.vmem %s29_s19, 2048  ;;  %p1013_p4 = scmp.lt.s32.totalorder %s29_s19, %s29_s19 }
   0xa   :  { %p1009_p3 = scmp.ne.s32.totalorder %s29_s19, %s1008_s27  ;;  %p1014_p5 = scmp.lt.s32.totalorder %s1008_s27, %s1008_s27 }
   0xc   :  { %p1015_p6 = por %p1014_p5, %p1013_p4 }
   0xe   :  { %p1016_p7 = pnand %p1015_p6, %p1009_p3 }
  0x10   :  { %1019 = shalt.err (!%p1016_p7)
}
  0x11   :  { %s1093_s28 = smov 256   ;;  %s1094_s29 = smov 16  }
  0x12   :  { %34 = dma.hbm_to_vmem [thread:$0]  %s1186_s1, 2048, %s29_s19, [#allocation6], %s1093_s28, %s1093_s28, %s1094_s29  }
  0x13   :  { %s1095_s7 = smov [#allocation2]   ;;  %s1096_s9 = smov [#allocation7]  }
  0x14   :  { %s19_s8 = sshll.u32 %s1095_s7, 4  ;;  %s42_s10 = sshll.u32 %s1096_s9, 4  ;;  %s20_s8 = int_to_ptr.vmem [resolvable:$true] %s19_s8  ;;  %s43_s10 = int_to_ptr.vmem [resolvable:$true] %s42_s10 }
  0x15   :  { %s1020_s13 = scalar_lea.hbm %s1185_s0, 16 }
  0x16   :  { %p1021_p8 = scmp.ne.s32.totalorder %s1185_s0, %s1020_s13  ;;  %p1024_p9 = scmp.lt.u32.totalorder %s1020_s13, %s1185_s0 }
  0x18   :  { %p1026_p10 = pnand %p1024_p9, %p1021_p8 }
  0x1a   :  { %1029 = shalt.err (!%p1026_p10)
}
  0x1b   :  { %s1030_s1 = scalar_lea.vmem %s20_s8, 16  ;;  %s1034_s18 = scalar_lea.vmem %s20_s8, 32 }
  0x1c   :  { %p1031_p11 = scmp.ne.s32.totalorder %s20_s8, %s1030_s1  ;;  %p1035_p12 = scmp.lt.s32.totalorder %s20_s8, %s20_s8 }
  0x1d   :  { %p1036_p13 = scmp.lt.s32.totalorder %s1034_s18, %s1030_s1 }
  0x1f   :  { %p1037_p0 = por %p1036_p13, %p1035_p12 }
  0x21   :  { %p1038_p1 = pnand %p1037_p0, %p1031_p11 }
  0x23   :  { %1041 = shalt.err (!%p1038_p1)
}
  0x24   :  { %22 = dma.hbm_to_vmem [thread:$0]  %s1185_s0, 16, %s20_s8, [#allocation3]  }
  0x25   :  { %s1042_s23 = scalar_lea.hbm %s1188_s3, 8192 }
  0x26   :  { %p1043_p2 = scmp.ne.s32.totalorder %s1188_s3, %s1042_s23  ;;  %p1046_p3 = scmp.lt.u32.totalorder %s1042_s23, %s1188_s3 }
  0x28   :  { %p1048_p4 = pnand %p1046_p3, %p1043_p2 }
  0x2a   :  { %1051 = shalt.err (!%p1048_p4)
}
  0x2b   :  { %s1052_s28 = scalar_lea.vmem %s43_s10, 8192  ;;  %p1057_p6 = scmp.lt.s32.totalorder %s43_s10, %s43_s10 }
  0x2c   :  { %p1053_p5 = scmp.ne.s32.totalorder %s43_s10, %s1052_s28  ;;  %p1058_p7 = scmp.lt.s32.totalorder %s1052_s28, %s1052_s28 }
  0x2e   :  { %p1059_p8 = por %p1058_p7, %p1057_p6 }
  0x30   :  { %p1060_p9 = pnand %p1059_p8, %p1053_p5 }
  0x32   :  { %1063 = shalt.err (!%p1060_p9)
}
  0x33   :  { %s1097_s0 = smov 128   ;;  %s1098_s29 = smov 8  }
  0x34   :  { %48 = dma.hbm_to_vmem [thread:$0]  %s1188_s3, 8192, %s43_s10, [#allocation6], %s1097_s0, %s1097_s0, %s1098_s29  }
  0x35   :  { %1086 = dma.done.wait [#allocation3], 16  }
  0x36   :  { %1087 = vsyncadd [#allocation3], 4294967280 }
  0x37   :  { %1088 = dma.done.wait [#allocation6], 10240  }
  0x38   :  { %1089 = vsyncadd [#allocation6], 4294957056  ;;  %v1099_v0 = vmov 0   ;;  %v878_v1 = vld [vmem:[#allocation5 + $0x4] ss:$16 sps:$4 sm:$0xff]   ;;  %vm180_vm0 = vcmask 523264  }
  0x39   :  { %216 = vmatprep.mubr.bf16.mxu0 %v1099_v0  ;;  %257 = vmatprep.mubr.bf16.mxu1 %v1099_v0  ;;  %v880_v2 = vld [vmem:[#allocation5 + $0xc] ss:$16 sps:$4 sm:$0xff]   ;;  %v882_v3 = vld [vmem:[#allocation5] ss:$16 sps:$4 sm:$0xff]   ;;  %v883_v4 = vld [vmem:[#allocation5 + $0x8] ss:$16 sps:$4 sm:$0xff]  }
  0x3a   :  { %184 = vmatprep.subr.bf16.mxu0 %v878_v1  ;;  %225 = vmatprep.subr.bf16.mxu1 %v880_v2  ;;  %v884_v5 = vld [vmem:[#allocation5 + $0x24] ss:$16 sps:$4 sm:$0xff]   ;;  %v886_v6 = vld [vmem:[#allocation5 + $0x2c] ss:$16 sps:$4 sm:$0xff]   ;;  %v888_v7 = vld [vmem:[#allocation5 + $0x20] ss:$16 sps:$4 sm:$0xff]  }
  0x3b   :  { %185 = vmatpush1.bf16.msra.mxu0 %v882_v3  ;;  %226 = vmatpush1.bf16.msra.mxu1 %v883_v4  ;;  %v889_v8 = vld [vmem:[#allocation5 + $0x28] ss:$16 sps:$4 sm:$0xff]   ;;  %v890_v9 = vld [vmem:[#allocation5 + $0x44] ss:$16 sps:$4 sm:$0xff]   ;;  %v892_v10 = vld [vmem:[#allocation5 + $0x4c] ss:$16 sps:$4 sm:$0xff]  }
  0x3c   :  { %186 = vmatprep.subr.bf16.mxu0 %v884_v5  ;;  %227 = vmatprep.subr.bf16.mxu1 %v886_v6  ;;  %v894_v11 = vld [vmem:[#allocation5 + $0x40] ss:$16 sps:$4 sm:$0xff]   ;;  %v895_v12 = vld [vmem:[#allocation5 + $0x48] ss:$16 sps:$4 sm:$0xff]   ;;  %v896_v13 = vld [vmem:[#allocation5 + $0x64] ss:$16 sps:$4 sm:$0xff]  }
  0x3d   :  { %v898_v14 = vld [vmem:[#allocation5 + $0x6c] ss:$16 sps:$4 sm:$0xff]   ;;  %v900_v15 = vld [vmem:[#allocation5 + $0x60] ss:$16 sps:$4 sm:$0xff]   ;;  %v901_v16 = vld [vmem:[#allocation5 + $0x68] ss:$16 sps:$4 sm:$0xff]  }
  0x3e   :  { %v904_v17 = vld [vmem:[#allocation7 + $0x4] ss:$8 sps:$4 sm:$0xff]   ;;  %v61_v19 = vld [vmem:[#allocation2] sm:$0x1]  ;;  %v902_v20 = vld [vmem:[#allocation7] ss:$8 sps:$4 sm:$0xff]  }
  0x3f   :  { %187 = vmatpush1.bf16.msra.mxu0 %v888_v7  ;;  %228 = vmatpush1.bf16.msra.mxu1 %v889_v8  ;;  %v907_v18 = vld [vmem:[#allocation7 + $0x104] ss:$8 sps:$4 sm:$0xff]   ;;  %v905_v21 = vld [vmem:[#allocation7 + $0x100] ss:$8 sps:$4 sm:$0xff]   ;;  %v910_v22 = vld [vmem:[#allocation7 + $0x14] ss:$8 sps:$4 sm:$0xff]  }
  0x40   :  { %188 = vmatprep.subr.bf16.mxu0 %v890_v9  ;;  %229 = vmatprep.subr.bf16.mxu1 %v892_v10  ;;  %v913_v23 = vld [vmem:[#allocation7 + $0x114] ss:$8 sps:$4 sm:$0xff]   ;;  %v908_v24 = vld [vmem:[#allocation7 + $0x10] ss:$8 sps:$4 sm:$0xff]   ;;  %v916_v26 = vld [vmem:[#allocation7 + $0x24] ss:$8 sps:$4 sm:$0xff]  }
  0x41   :  { %v911_v25 = vld [vmem:[#allocation7 + $0x110] ss:$8 sps:$4 sm:$0xff]   ;;  %v919_v27 = vld [vmem:[#allocation7 + $0x124] ss:$8 sps:$4 sm:$0xff]   ;;  %v914_v28 = vld [vmem:[#allocation7 + $0x20] ss:$8 sps:$4 sm:$0xff]  }
  0x42   :  { %v917_v29 = vld [vmem:[#allocation7 + $0x120] ss:$8 sps:$4 sm:$0xff]   ;;  %v922_v30 = vld [vmem:[#allocation7 + $0x34] ss:$8 sps:$4 sm:$0xff]   ;;  %v920_v32 = vld [vmem:[#allocation7 + $0x30] ss:$8 sps:$4 sm:$0xff]  }
  0x43   :  { %189 = vmatpush1.bf16.msra.mxu0 %v894_v11  ;;  %230 = vmatpush1.bf16.msra.mxu1 %v895_v12  ;;  %v925_v31 = vld [vmem:[#allocation7 + $0x134] ss:$8 sps:$4 sm:$0xff]   ;;  %v923_v33 = vld [vmem:[#allocation7 + $0x130] ss:$8 sps:$4 sm:$0xff]   ;;  %v928_v34 = vld [vmem:[#allocation7 + $0x44] ss:$8 sps:$4 sm:$0xff]  }
  0x44   :  { %190 = vmatprep.subr.bf16.mxu0 %v896_v13  ;;  %231 = vmatprep.subr.bf16.mxu1 %v898_v14  ;;  %v931_v35 = vld [vmem:[#allocation7 + $0x144] ss:$8 sps:$4 sm:$0xff]   ;;  %v926_v36 = vld [vmem:[#allocation7 + $0x40] ss:$8 sps:$4 sm:$0xff]   ;;  %v934_v38 = vld [vmem:[#allocation7 + $0x54] ss:$8 sps:$4 sm:$0xff]  }
  0x45   :  { %v929_v37 = vld [vmem:[#allocation7 + $0x140] ss:$8 sps:$4 sm:$0xff]   ;;  %v937_v39 = vld [vmem:[#allocation7 + $0x154] ss:$8 sps:$4 sm:$0xff]   ;;  %v932_v40 = vld [vmem:[#allocation7 + $0x50] ss:$8 sps:$4 sm:$0xff]  }
  0x46   :  { %v935_v41 = vld [vmem:[#allocation7 + $0x150] ss:$8 sps:$4 sm:$0xff]   ;;  %v940_v42 = vld [vmem:[#allocation7 + $0x64] ss:$8 sps:$4 sm:$0xff]   ;;  %v938_v44 = vld [vmem:[#allocation7 + $0x60] ss:$8 sps:$4 sm:$0xff]  }
  0x47   :  { %191 = vmatpush1.bf16.msra.mxu0 %v900_v15  ;;  %232 = vmatpush1.bf16.msra.mxu1 %v901_v16  ;;  %v943_v43 = vld [vmem:[#allocation7 + $0x164] ss:$8 sps:$4 sm:$0xff]   ;;  %v941_v45 = vld [vmem:[#allocation7 + $0x160] ss:$8 sps:$4 sm:$0xff]   ;;  %v946_v46 = vld [vmem:[#allocation7 + $0x74] ss:$8 sps:$4 sm:$0xff]  }
  0x48   :  { %670 = vmatprep.subr.bf16.mxu1 %v904_v17  ;;  %711 = vmatprep.subr.bf16.mxu0 %v907_v18  ;;  %v949_v47 = vld [vmem:[#allocation7 + $0x174] ss:$8 sps:$4 sm:$0xff]   ;;  %v944_v48 = vld [vmem:[#allocation7 + $0x70] ss:$8 sps:$4 sm:$0xff]   ;;  %v952_v50 = vld [vmem:[#allocation7 + $0x84] ss:$8 sps:$4 sm:$0xff]   ;;  %v80_v18 = vlaneseq }
  0x49   :  { %v947_v49 = vld [vmem:[#allocation7 + $0x170] ss:$8 sps:$4 sm:$0xff]   ;;  %v955_v51 = vld [vmem:[#allocation7 + $0x184] ss:$8 sps:$4 sm:$0xff]   ;;  %v950_v52 = vld [vmem:[#allocation7 + $0x80] ss:$8 sps:$4 sm:$0xff]  }
  0x4a   :  { %798 = vmatmul.mubr.msk.bf16.vlgmr.msra.gmra.mrb[0].mxu0 %vm180_vm0, %v61_v19  ;;  %799 = vmatmul.mubr.msk.bf16.vlgmr.msra.gmra.mrb[0].mxu1 %vm180_vm0, %v61_v19  ;;  %v953_v53 = vld [vmem:[#allocation7 + $0x180] ss:$8 sps:$4 sm:$0xff]   ;;  %v958_v54 = vld [vmem:[#allocation7 + $0x94] ss:$8 sps:$4 sm:$0xff]   ;;  %v956_v56 = vld [vmem:[#allocation7 + $0x90] ss:$8 sps:$4 sm:$0xff]  }
  0x4b   :  { %671 = vmatpush1.bf16.msra.mxu1 %v902_v20  ;;  %712 = vmatpush1.bf16.msra.mxu0 %v905_v21  ;;  %v961_v55 = vld [vmem:[#allocation7 + $0x194] ss:$8 sps:$4 sm:$0xff]   ;;  %v959_v57 = vld [vmem:[#allocation7 + $0x190] ss:$8 sps:$4 sm:$0xff]   ;;  %v964_v58 = vld [vmem:[#allocation7 + $0xa4] ss:$8 sps:$4 sm:$0xff]  }
  0x4c   :  { %672 = vmatprep.subr.bf16.mxu1 %v910_v22  ;;  %713 = vmatprep.subr.bf16.mxu0 %v913_v23  ;;  %v967_v59 = vld [vmem:[#allocation7 + $0x1a4] ss:$8 sps:$4 sm:$0xff]   ;;  %v962_v60 = vld [vmem:[#allocation7 + $0xa0] ss:$8 sps:$4 sm:$0xff]   ;;  %v970_v62 = vld [vmem:[#allocation7 + $0xb4] ss:$8 sps:$4 sm:$0xff]  }
  0x4d   :  { %v965_v61 = vld [vmem:[#allocation7 + $0x1a0] ss:$8 sps:$4 sm:$0xff]   ;;  %v973_v63 = vld [vmem:[#allocation7 + $0x1b4] ss:$8 sps:$4 sm:$0xff]   ;;  %v968_v0 = vld [vmem:[#allocation7 + $0xb0] ss:$8 sps:$4 sm:$0xff]  }
  0x4e   :  { %v971_v1 = vld [vmem:[#allocation7 + $0x1b0] ss:$8 sps:$4 sm:$0xff]   ;;  %v976_v2 = vld [vmem:[#allocation7 + $0xc4] ss:$8 sps:$4 sm:$0xff]   ;;  %v974_v4 = vld [vmem:[#allocation7 + $0xc0] ss:$8 sps:$4 sm:$0xff]  }
  0x4f   :  { %673 = vmatpush1.bf16.msra.mxu1 %v908_v24  ;;  %714 = vmatpush1.bf16.msra.mxu0 %v911_v25  ;;  %v979_v3 = vld [vmem:[#allocation7 + $0x1c4] ss:$8 sps:$4 sm:$0xff]   ;;  %v977_v5 = vld [vmem:[#allocation7 + $0x1c0] ss:$8 sps:$4 sm:$0xff]   ;;  %v982_v6 = vld [vmem:[#allocation7 + $0xd4] ss:$8 sps:$4 sm:$0xff]  }
  0x50   :  { %674 = vmatprep.subr.bf16.mxu1 %v916_v26  ;;  %715 = vmatprep.subr.bf16.mxu0 %v919_v27  ;;  %v985_v7 = vld [vmem:[#allocation7 + $0x1d4] ss:$8 sps:$4 sm:$0xff]   ;;  %v980_v8 = vld [vmem:[#allocation7 + $0xd0] ss:$8 sps:$4 sm:$0xff]   ;;  %v988_v10 = vld [vmem:[#allocation7 + $0xe4] ss:$8 sps:$4 sm:$0xff]  }
  0x51   :  { %v983_v9 = vld [vmem:[#allocation7 + $0x1d0] ss:$8 sps:$4 sm:$0xff]   ;;  %v991_v11 = vld [vmem:[#allocation7 + $0x1e4] ss:$8 sps:$4 sm:$0xff]   ;;  %v986_v12 = vld [vmem:[#allocation7 + $0xe0] ss:$8 sps:$4 sm:$0xff]  }
  0x52   :  { %v989_v13 = vld [vmem:[#allocation7 + $0x1e0] ss:$8 sps:$4 sm:$0xff]   ;;  %v994_v14 = vld [vmem:[#allocation7 + $0xf4] ss:$8 sps:$4 sm:$0xff]   ;;  %v992_v16 = vld [vmem:[#allocation7 + $0xf0] ss:$8 sps:$4 sm:$0xff]  }
  0x53   :  { %675 = vmatpush1.bf16.msra.mxu1 %v914_v28  ;;  %716 = vmatpush1.bf16.msra.mxu0 %v917_v29  ;;  %v997_v15 = vld [vmem:[#allocation7 + $0x1f4] ss:$8 sps:$4 sm:$0xff]   ;;  %v995_v17 = vld [vmem:[#allocation7 + $0x1f0] ss:$8 sps:$4 sm:$0xff]   ;;  %v81_v19 = vshrl.u32 %v80_v18, 7  ;;  %s1100_s9 = smov [#allocation8]  }
  0x54   :  { %676 = vmatprep.subr.bf16.mxu1 %v922_v30  ;;  %717 = vmatprep.subr.bf16.mxu0 %v925_v31  ;;  %v78_v22 = vld [vmem:[%s1187_s2] sm:$0xf]  ;;  %s772_s10 = sshll.u32 %s1100_s9, 4  ;;  %s773_s10 = int_to_ptr.vmem [resolvable:$true] %s772_s10 }
  0x55   :  { %v82_v20 = vsub.s32 0, %v81_v19  ;;  %v90_v21 = vsub.s32 2, %v81_v19  ;;  %v86_v23 = vsub.s32 1, %v81_v19  ;;  %v94_v24 = vsub.s32 3, %v81_v19  ;;  %p1069_p11 = scmp.lt.s32.totalorder %s773_s10, %s773_s10 }
  0x57   :  { %677 = vmatpush1.bf16.msra.mxu1 %v920_v32  ;;  %718 = vmatpush1.bf16.msra.mxu0 %v923_v33  ;;  %v83_v25 = vrot.slane %v78_v22, %v82_v20  ;;  %v91_v26 = vrot.slane %v78_v22, %v90_v21  ;;  %v87_v27 = vrot.slane %v78_v22, %v86_v23 }
  0x58   :  { %678 = vmatprep.subr.bf16.mxu1 %v928_v34  ;;  %719 = vmatprep.subr.bf16.mxu0 %v931_v35  ;;  %v95_v28 = vrot.slane %v78_v22, %v94_v24 }
  0x5b   :  { %679 = vmatpush1.bf16.msra.mxu1 %v926_v36  ;;  %720 = vmatpush1.bf16.msra.mxu0 %v929_v37 }
  0x5c   :  { %680 = vmatprep.subr.bf16.mxu1 %v934_v38  ;;  %721 = vmatprep.subr.bf16.mxu0 %v937_v39 }
  0x5f   :  { %681 = vmatpush1.bf16.msra.mxu1 %v932_v40  ;;  %722 = vmatpush1.bf16.msra.mxu0 %v935_v41 }
  0x60   :  { %682 = vmatprep.subr.bf16.mxu1 %v940_v42  ;;  %723 = vmatprep.subr.bf16.mxu0 %v943_v43 }
  0x63   :  { %683 = vmatpush1.bf16.msra.mxu1 %v938_v44  ;;  %724 = vmatpush1.bf16.msra.mxu0 %v941_v45 }
  0x64   :  { %684 = vmatprep.subr.bf16.mxu1 %v946_v46  ;;  %725 = vmatprep.subr.bf16.mxu0 %v949_v47 }
  0x67   :  { %685 = vmatpush1.bf16.msra.mxu1 %v944_v48  ;;  %726 = vmatpush1.bf16.msra.mxu0 %v947_v49  ;;  %v338_v49 = vld [vmem:[%s1189_s4] sm:$0x3]  ;;  %s1064_s4 = scalar_lea.vmem %s773_s10, 64 }
  0x68   :  { %686 = vmatprep.subr.bf16.mxu1 %v952_v50  ;;  %727 = vmatprep.subr.bf16.mxu0 %v955_v51  ;;  %v343_v50 = vrot.slane %v338_v49, %v82_v20  ;;  %v347_v51 = vrot.slane %v338_v49, %v86_v23  ;;  %p1065_p10 = scmp.ne.s32.totalorder %s773_s10, %s1064_s4  ;;  %p1070_p12 = scmp.lt.s32.totalorder %s1064_s4, %s1064_s4 }
  0x6a   :  { %p1071_p13 = por %p1070_p12, %p1069_p11 }
  0x6b   :  { %687 = vmatpush1.bf16.msra.mxu1 %v950_v52  ;;  %728 = vmatpush1.bf16.msra.mxu0 %v953_v53 }
  0x6c   :  { %688 = vmatprep.subr.bf16.mxu1 %v958_v54  ;;  %729 = vmatprep.subr.bf16.mxu0 %v961_v55  ;;  %p1072_p0 = pnand %p1071_p13, %p1065_p10 }
  0x6f   :  { %689 = vmatpush1.bf16.msra.mxu1 %v956_v56  ;;  %730 = vmatpush1.bf16.msra.mxu0 %v959_v57 }
  0x70   :  { %690 = vmatprep.subr.bf16.mxu1 %v964_v58  ;;  %731 = vmatprep.subr.bf16.mxu0 %v967_v59 }
  0x73   :  { %691 = vmatpush1.bf16.msra.mxu1 %v962_v60  ;;  %732 = vmatpush1.bf16.msra.mxu0 %v965_v61 }
  0x74   :  { %692 = vmatprep.subr.bf16.mxu1 %v970_v62  ;;  %733 = vmatprep.subr.bf16.mxu0 %v973_v63 }
  0x77   :  { %693 = vmatpush1.bf16.msra.mxu1 %v968_v0  ;;  %734 = vmatpush1.bf16.msra.mxu0 %v971_v1 }
  0x78   :  { %694 = vmatprep.subr.bf16.mxu1 %v976_v2  ;;  %735 = vmatprep.subr.bf16.mxu0 %v979_v3 }
  0x7b   :  { %695 = vmatpush1.bf16.msra.mxu1 %v974_v4  ;;  %736 = vmatpush1.bf16.msra.mxu0 %v977_v5 }
  0x7c   :  { %696 = vmatprep.subr.bf16.mxu1 %v982_v6  ;;  %737 = vmatprep.subr.bf16.mxu0 %v985_v7 }
  0x7f   :  { %697 = vmatpush1.bf16.msra.mxu1 %v980_v8  ;;  %738 = vmatpush1.bf16.msra.mxu0 %v983_v9 }
  0x80   :  { %698 = vmatprep.subr.bf16.mxu1 %v988_v10  ;;  %739 = vmatprep.subr.bf16.mxu0 %v991_v11 }
  0x83   :  { %699 = vmatpush1.bf16.msra.mxu1 %v986_v12  ;;  %740 = vmatpush1.bf16.msra.mxu0 %v989_v13 }
  0x84   :  { %700 = vmatprep.subr.bf16.mxu1 %v994_v14  ;;  %741 = vmatprep.subr.bf16.mxu0 %v997_v15 }
  0x87   :  { %701 = vmatpush1.bf16.msra.mxu1 %v992_v16  ;;  %742 = vmatpush1.bf16.msra.mxu0 %v995_v17 }
 0x11d   :  { %v218_v29 = vpop.f32.mrb[0].mxu0  ;;  %v259_v30 = vpop.f32.mrb[0].mxu1 }
 0x11e   :  { %v219_v31 = vadd.f32 %v218_v29, %v83_v25  ;;  %v260_v32 = vadd.f32 %v259_v30, %v91_v26  ;;  %v220_v33 = vpop.f32.mrb[1].mxu0  ;;  %v261_v34 = vpop.f32.mrb[1].mxu1 }
 0x11f   :  { %v221_v35 = vadd.f32 %v220_v33, %v87_v27  ;;  %v262_v36 = vadd.f32 %v261_v34, %v95_v28  ;;  %v222_v37 = vpop.f32.mrb[2].mxu0  ;;  %v263_v38 = vpop.f32.mrb[2].mxu1 }
 0x120   :  { %v266_v39 = vmax.f32 %v219_v31, 0.0  ;;  %v268_v40 = vmax.f32 %v260_v32, 0.0  ;;  %v223_v41 = vpop.f32.mrb[3].mxu0  ;;  %v264_v42 = vpop.f32.mrb[3].mxu1 }
 0x121   :  { %v267_v43 = vmax.f32 %v221_v35, 0.0  ;;  %v269_v44 = vmax.f32 %v262_v36, 0.0 }
 0x122   :  { %v272_v45 = vpack.c.bf16 %v268_v40, %v268_v40  ;;  %v270_v48 = vpack.c.bf16 %v266_v39, %v266_v39 }
 0x123   :  { %v271_v46 = vpack.c.bf16 %v267_v43, %v267_v43  ;;  %v273_v47 = vpack.c.bf16 %v269_v44, %v269_v44 }
 0x125   :  { %702 = vmatprep.mubr.bf16.mxu1 %v271_v46  ;;  %743 = vmatprep.mubr.bf16.mxu0 %v273_v47 }
 0x126   :  { %703 = vmatmul.mubr.bf16.vlgmr.msra.gmra.mrb[4].mxu1 %v270_v48  ;;  %744 = vmatmul.mubr.bf16.vlgmr.msra.gmra.mrb[4].mxu0 %v272_v45 }
 0x1f9   :  { %v704_v52 = vpop.f32.mrb[4].mxu1  ;;  %v745_v53 = vpop.f32.mrb[4].mxu0 }
 0x1fa   :  { %v705_v54 = vadd.f32 %v704_v52, %v343_v50  ;;  %v706_v55 = vpop.f32.mrb[5].mxu1  ;;  %v747_v56 = vpop.f32.mrb[5].mxu0 }
 0x1fb   :  { %v707_v57 = vadd.f32 %v706_v55, %v347_v51  ;;  %v708_v58 = vpop.f32.mrb[6].mxu1  ;;  %v749_v59 = vpop.f32.mrb[6].mxu0 }
 0x1fc   :  { %v746_v60 = vadd.f32 %v745_v53, %v705_v54  ;;  %v709_v61 = vpop.f32.mrb[7].mxu1  ;;  %v750_v62 = vpop.f32.mrb[7].mxu0 }
 0x1fd   :  { %v748_v63 = vadd.f32 %v747_v56, %v707_v57 }
 0x1fe   :  { %v752_v0 = vmax.f32 %v746_v60, 0.0 }
 0x1ff   :  { %v753_v1 = vmax.f32 %v748_v63, 0.0 }
 0x201   :  { %v756_v2 = vcombine.low %v752_v0, %v753_v1 }
 0x203   :  { %864 = vst.sshfl [vmem:[#allocation8] sm:$0x33 pattern:$0x76325410] %v756_v2 }
 0x204   :  { %1075 = shalt.err (!%p1072_p0)
}
 0x205   :  { %s1076_s13 = scalar_lea.hbm %s1190_s5, 64 }
 0x206   :  { %p1077_p1 = scmp.ne.s32.totalorder %s1190_s5, %s1076_s13  ;;  %p1080_p2 = scmp.lt.u32.totalorder %s1076_s13, %s1190_s5 }
 0x208   :  { %p1082_p3 = pnand %p1080_p2, %p1077_p1 }
 0x20a   :  { %1085 = shalt.err (!%p1082_p3)
}
 0x20b   :  { %775 = dma.vmem_to_hbm [thread:$0]  %s773_s10, 64, %s1190_s5, [#allocation4]  }
 0x20c   :  { %1090 = dma.done.wait [#allocation4], 64  }
 0x20d   :  { %1091 = vsyncadd [#allocation4], 4294967232 }
 0x20e   :  { %779 = vsyncpa [#allocation3], 1 }
 0x20f   :  { %780 = vsyncpa [#allocation6], 1 }
 0x210   :  { %781 = vsyncpa [#allocation4], 1 }

</bundles_post_ra>
